<compile_context>
chip_gen: v7x
topology: tpu7x:2x2x1
jax: 0.10.0
libtpu: 0.0.40
codegen_flags: <defaults>
</compile_context>

<pallas_src>
import jax
import jax.numpy as jnp
from jax.experimental import pallas as pl
from jax.experimental.pallas import tpu as pltpu

BETA = 0.95
THRESHOLD = 1.0
NUM_INPUTS = 28 * 28   # 784
NUM_HIDDEN = 200
NUM_OUTPUTS = 10
NUM_STEPS = 5
PAD_OUT = 128          # lane-padded output width -> unmasked, lane-dense stores


def snn_kernel(x_ref, w1_ref, b1_ref, w2_ref, b2_ref, out_ref):
    # x_ref:  [TB, 784] f32      w1_ref: [784, 200] bf16   b1_ref: [1, 200] f32
    # w2_ref: [200, 128] bf16 (zero-padded lanes 10..127)   b2_ref: [1, 128] f32
    # out_ref: [2, NUM_STEPS, TB, 128] f32  (out[0]=spk, out[1]=mem; lanes 10..127 stay 0)
    x = x_ref[...]
    TB = x.shape[0]

    # fc1 once -- the input is constant over the 5 time steps. bf16 operands, f32 accumulate.
    cur1 = jnp.dot(x.astype(jnp.bfloat16), w1_ref[...],
                   preferred_element_type=jnp.float32) + b1_ref[...]        # [TB, 200] f32

    # ---- layer-1 LIF recurrence (VPU only; depends only on the constant cur1) ----
    # reset_{t} == spk_{t-1}; threshold == 1.0 so the reset multiply is dropped.
    mem1 = jnp.zeros((TB, NUM_HIDDEN), jnp.float32)
    spk1 = jnp.zeros((TB, NUM_HIDDEN), jnp.float32)
    spk1_steps = []
    for _ in range(NUM_STEPS):
        mem1 = BETA * mem1 + cur1 - spk1
        spk1 = (mem1 > THRESHOLD).astype(jnp.float32)
        spk1_steps.append(spk1)

    # ---- fc2 hoisted: ONE MXU pass over all time steps ----
    spk1_all = jnp.concatenate(spk1_steps, axis=0).astype(jnp.bfloat16)     # [5*TB, 200] bf16
    cur2_all = jnp.dot(spk1_all, w2_ref[...],
                       preferred_element_type=jnp.float32) + b2_ref[...]    # [5*TB, 128] f32

    # ---- layer-2 LIF recurrence on 128-lane padded tiles ----
    # Padded lanes: w2 col = 0, b2 = 0 -> cur2 = 0 -> mem stays 0, spk stays 0 (sliced off in wrapper).
    mem2 = jnp.zeros((TB, PAD_OUT), jnp.float32)
    spk2 = jnp.zeros((TB, PAD_OUT), jnp.float32)
    for t in range(NUM_STEPS):
        cur2 = cur2_all[t * TB:(t + 1) * TB, :]                             # static, sublane-aligned slice
        mem2 = BETA * mem2 + cur2 - spk2
        spk2 = (mem2 > THRESHOLD).astype(jnp.float32)
        # Full-tile (TB, 128) unmasked, lane-dense stores into the single merged output block.
        out_ref[0, t, :, :] = spk2
        out_ref[1, t, :, :] = mem2


def prepare_params(w1, b1, w2, b2):
    """One-time (init) conversion to kernel-ready params: bf16 weights, 128-lane padded fc2.

    Done once, outside the forward path, so the per-call wrapper does no casting/padding.
    """
    w1_bf16 = w1.astype(jnp.bfloat16)
    w2_pad = jnp.zeros((NUM_HIDDEN, PAD_OUT), jnp.bfloat16)
    w2_pad = w2_pad.at[:, :NUM_OUTPUTS].set(w2.astype(jnp.bfloat16))
    b2_pad = jnp.zeros((1, PAD_OUT), jnp.float32)
    b2_pad = b2_pad.at[:, :NUM_OUTPUTS].set(b2)
    return w1_bf16, b1, w2_pad, b2_pad


def snn_forward(x, w1_bf16, b1, w2_pad, b2_pad, tb=None):
    """x: [B, 784] f32; params are the pre-converted outputs of prepare_params.

    tb: batch tile (multiple of 8, divides B). Weights stay VMEM-resident across tiles;
    the batch axis is 'parallel' so v7x can split tiles across its two TensorCores.
    """
    B = x.shape[0]
    TB = B if tb is None else tb
    assert B % TB == 0 and TB % 8 == 0, "batch tile must be a multiple of 8 and divide B"
    grid = (B // TB,)

    out_shape = jax.ShapeDtypeStruct((2, NUM_STEPS, B, PAD_OUT), jnp.float32)

    grid_spec = pltpu.PrefetchScalarGridSpec(
        num_scalar_prefetch=0,
        grid=grid,
        in_specs=[
            pl.BlockSpec((TB, NUM_INPUTS), lambda i: (i, 0)),
            pl.BlockSpec((NUM_INPUTS, NUM_HIDDEN), lambda i: (0, 0)),   # weights: same block
            pl.BlockSpec((1, NUM_HIDDEN), lambda i: (0, 0)),            # every tile -> resident
            pl.BlockSpec((NUM_HIDDEN, PAD_OUT), lambda i: (0, 0)),
            pl.BlockSpec((1, PAD_OUT), lambda i: (0, 0)),
        ],
        out_specs=pl.BlockSpec((2, NUM_STEPS, TB, PAD_OUT), lambda i: (0, 0, i, 0)),
    )

    out = pl.pallas_call(
        snn_kernel,
        out_shape=out_shape,
        grid_spec=grid_spec,
        compiler_params=pltpu.CompilerParams(
            dimension_semantics=("parallel",),
        ),
    )(x, w1_bf16, b1, w2_pad, b2_pad)

    # Strip lane padding only (no reshape needed): (NUM_STEPS, B, NUM_OUTPUTS) layout of the module.
    spk_out = out[0, :, :, :NUM_OUTPUTS]
    mem_out = out[1, :, :, :NUM_OUTPUTS]
    return spk_out, mem_out


def init_params(key):
    # Deterministic init mimicking nn.Linear default: U(-1/sqrt(fan_in), 1/sqrt(fan_in)).
    k1, k2, k3, k4 = jax.random.split(key, 4)
    lim1 = 1.0 / (NUM_INPUTS ** 0.5)
    lim2 = 1.0 / (NUM_HIDDEN ** 0.5)
    w1 = jax.random.uniform(k1, (NUM_INPUTS, NUM_HIDDEN), jnp.float32, -lim1, lim1)
    b1 = jax.random.uniform(k2, (1, NUM_HIDDEN), jnp.float32, -lim1, lim1)
    w2 = jax.random.uniform(k3, (NUM_HIDDEN, NUM_OUTPUTS), jnp.float32, -lim2, lim2)
    b2 = jax.random.uniform(k4, (1, NUM_OUTPUTS), jnp.float32, -lim2, lim2)
    return w1, b1, w2, b2


def reference_forward(x, w1, b1, w2, b2):
    """Pure-JAX reference of the PyTorch/snntorch forward (explicit snntorch reset semantics),
    matching the kernel's bf16 matmul numerics."""
    B = x.shape[0]
    w1_bf, w2_bf = w1.astype(jnp.bfloat16), w2.astype(jnp.bfloat16)
    cur1 = jnp.dot(x.astype(jnp.bfloat16), w1_bf, preferred_element_type=jnp.float32) + b1
    mem1 = jnp.zeros((B, NUM_HIDDEN), jnp.float32)
    mem2 = jnp.zeros((B, NUM_OUTPUTS), jnp.float32)
    spks, mems = [], []
    for _ in range(NUM_STEPS):
        reset1 = (mem1 > THRESHOLD).astype(jnp.float32)
        mem1 = BETA * mem1 + cur1 - reset1 * THRESHOLD
        spk1 = (mem1 > THRESHOLD).astype(jnp.float32)
        cur2 = jnp.dot(spk1.astype(jnp.bfloat16), w2_bf,
                       preferred_element_type=jnp.float32) + b2
        reset2 = (mem2 > THRESHOLD).astype(jnp.float32)
        mem2 = BETA * mem2 + cur2 - reset2 * THRESHOLD
        spk2 = (mem2 > THRESHOLD).astype(jnp.float32)
        spks.append(spk2)
        mems.append(mem2)
    return jnp.stack(spks, 0), jnp.stack(mems, 0)


if __name__ == "__main__":
    key = jax.random.PRNGKey(0)
    kx, kp = jax.random.split(key)

    B = 8  # small batch for the smoke test (at this size the kernel is launch/DMA bound)
    # Scale input so some neurons actually cross the firing threshold.
    x = jax.random.uniform(kx, (B, NUM_INPUTS), jnp.float32, 0.0, 1.0)
    w1, b1, w2, b2 = init_params(kp)

    # One-time parameter preparation (outside the per-call path).
    w1_k, b1_k, w2_k, b2_k = prepare_params(w1, b1, w2, b2)
    w1_k, b1_k, w2_k, b2_k = jax.block_until_ready((w1_k, b1_k, w2_k, b2_k))

    spk_out, mem_out = snn_forward(x, w1_k, b1_k, w2_k, b2_k)
    jax.block_until_ready((spk_out, mem_out))

    # Cross-check against the pure-JAX reference of the PyTorch module.
    spk_ref, mem_ref = reference_forward(x, w1, b1, w2, b2)
    assert spk_out.shape == (NUM_STEPS, B, NUM_OUTPUTS)
    assert mem_out.shape == (NUM_STEPS, B, NUM_OUTPUTS)
    assert jnp.allclose(spk_out, spk_ref, atol=1e-5)
    assert jnp.allclose(mem_out, mem_ref, atol=1e-3)

    print("KERNEL_OK")
</pallas_src>

<mosaic_0001>
module attributes {stable_mosaic.version = 11 : i64} {
  func.func @snn_kernel(%arg0: i32, %arg1: memref<8x784xf32, #tpu.memory_space<vmem>>, %arg2: memref<784x200xbf16, #tpu.memory_space<vmem>>, %arg3: memref<1x200xf32, #tpu.memory_space<vmem>>, %arg4: memref<200x128xbf16, #tpu.memory_space<vmem>>, %arg5: memref<1x128xf32, #tpu.memory_space<vmem>>, %arg6: memref<2x5x8x128xf32, #tpu.memory_space<vmem>>) attributes {dimension_semantics = [#tpu.dimension_semantics<parallel>], iteration_bounds = array<i64: 1>, scalar_prefetch = 0 : i64, scratch_operands = 0 : i64, tpu.core_type = #tpu.core_type<tc>, window_params = [{transform_indices = @transform_0, window_bounds = array<i64: 8, 784>}, {pipeline_mode = #tpu.pipeline_mode<synchronous>, transform_indices = @transform_1, window_bounds = array<i64: 784, 200>}, {pipeline_mode = #tpu.pipeline_mode<synchronous>, transform_indices = @transform_2, window_bounds = array<i64: 1, 200>}, {pipeline_mode = #tpu.pipeline_mode<synchronous>, transform_indices = @transform_3, window_bounds = array<i64: 200, 128>}, {pipeline_mode = #tpu.pipeline_mode<synchronous>, transform_indices = @transform_4, window_bounds = array<i64: 1, 128>}, {transform_indices = @transform_5, window_bounds = array<i64: 2, 5, 8, 128>}]} {
    %c0 = arith.constant 0 : index
    %c0_0 = arith.constant 0 : index
    %0 = vector.load %arg1[%c0, %c0_0] : memref<8x784xf32, #tpu.memory_space<vmem>>, vector<8x784xf32>
    %1 = arith.truncf %0 : vector<8x784xf32> to vector<8x784xbf16>
    %c0_1 = arith.constant 0 : index
    %c0_2 = arith.constant 0 : index
    %2 = vector.load %arg2[%c0_1, %c0_2] : memref<784x200xbf16, #tpu.memory_space<vmem>>, vector<784x200xbf16>
    %cst = arith.constant dense<0.000000e+00> : vector<8x200xf32>
    %3 = tpu.matmul %1, %2, %cst {dimension_numbers = #tpu.dot_dimension_numbers<[1], [0], [0], [1], [0, 0, 1, 1], [], []>} : vector<8x784xbf16>, vector<784x200xbf16>, vector<8x200xf32> -> vector<8x200xf32>
    %c0_3 = arith.constant 0 : index
    %c0_4 = arith.constant 0 : index
    %4 = vector.load %arg3[%c0_3, %c0_4] : memref<1x200xf32, #tpu.memory_space<vmem>>, vector<1x200xf32>
    %5 = vector.broadcast %4 : vector<1x200xf32> to vector<8x200xf32>
    %6 = arith.addf %3, %5 : vector<8x200xf32>
    %cst_5 = arith.constant 0.000000e+00 : f32
    %7 = vector.broadcast %cst_5 : f32 to vector<8x200xf32>
    %cst_6 = arith.constant 0.000000e+00 : f32
    %8 = vector.broadcast %cst_6 : f32 to vector<8x200xf32>
    %cst_7 = arith.constant 0.949999988 : f32
    %9 = vector.broadcast %cst_7 : f32 to vector<8x200xf32>
    %10 = arith.mulf %9, %7 : vector<8x200xf32>
    %11 = arith.addf %10, %6 : vector<8x200xf32>
    %12 = arith.subf %11, %8 : vector<8x200xf32>
    %cst_8 = arith.constant 1.000000e+00 : f32
    %13 = vector.broadcast %cst_8 : f32 to vector<8x200xf32>
    %14 = arith.cmpf ogt, %12, %13 : vector<8x200xf32>
    %15 = arith.extui %14 : vector<8x200xi1> to vector<8x200xi32>
    %16 = arith.sitofp %15 : vector<8x200xi32> to vector<8x200xf32>
    %cst_9 = arith.constant 0.949999988 : f32
    %17 = vector.broadcast %cst_9 : f32 to vector<8x200xf32>
    %18 = arith.mulf %17, %12 : vector<8x200xf32>
    %19 = arith.addf %18, %6 : vector<8x200xf32>
    %20 = arith.subf %19, %16 : vector<8x200xf32>
    %cst_10 = arith.constant 1.000000e+00 : f32
    %21 = vector.broadcast %cst_10 : f32 to vector<8x200xf32>
    %22 = arith.cmpf ogt, %20, %21 : vector<8x200xf32>
    %23 = arith.extui %22 : vector<8x200xi1> to vector<8x200xi32>
    %24 = arith.sitofp %23 : vector<8x200xi32> to vector<8x200xf32>
    %cst_11 = arith.constant 0.949999988 : f32
    %25 = vector.broadcast %cst_11 : f32 to vector<8x200xf32>
    %26 = arith.mulf %25, %20 : vector<8x200xf32>
    %27 = arith.addf %26, %6 : vector<8x200xf32>
    %28 = arith.subf %27, %24 : vector<8x200xf32>
    %cst_12 = arith.constant 1.000000e+00 : f32
    %29 = vector.broadcast %cst_12 : f32 to vector<8x200xf32>
    %30 = arith.cmpf ogt, %28, %29 : vector<8x200xf32>
    %31 = arith.extui %30 : vector<8x200xi1> to vector<8x200xi32>
    %32 = arith.sitofp %31 : vector<8x200xi32> to vector<8x200xf32>
    %cst_13 = arith.constant 0.949999988 : f32
    %33 = vector.broadcast %cst_13 : f32 to vector<8x200xf32>
    %34 = arith.mulf %33, %28 : vector<8x200xf32>
    %35 = arith.addf %34, %6 : vector<8x200xf32>
    %36 = arith.subf %35, %32 : vector<8x200xf32>
    %cst_14 = arith.constant 1.000000e+00 : f32
    %37 = vector.broadcast %cst_14 : f32 to vector<8x200xf32>
    %38 = arith.cmpf ogt, %36, %37 : vector<8x200xf32>
    %39 = arith.extui %38 : vector<8x200xi1> to vector<8x200xi32>
    %40 = arith.sitofp %39 : vector<8x200xi32> to vector<8x200xf32>
    %cst_15 = arith.constant 0.949999988 : f32
    %41 = vector.broadcast %cst_15 : f32 to vector<8x200xf32>
    %42 = arith.mulf %41, %36 : vector<8x200xf32>
    %43 = arith.addf %42, %6 : vector<8x200xf32>
    %44 = arith.subf %43, %40 : vector<8x200xf32>
    %cst_16 = arith.constant 1.000000e+00 : f32
    %45 = vector.broadcast %cst_16 : f32 to vector<8x200xf32>
    %46 = arith.cmpf ogt, %44, %45 : vector<8x200xf32>
    %47 = arith.extui %46 : vector<8x200xi1> to vector<8x200xi32>
    %48 = arith.sitofp %47 : vector<8x200xi32> to vector<8x200xf32>
    %49 = tpu.concatenate %16, %24, %32, %40, %48 in 0 : vector<8x200xf32>, vector<8x200xf32>, vector<8x200xf32>, vector<8x200xf32>, vector<8x200xf32> -> vector<40x200xf32>
    %50 = arith.truncf %49 : vector<40x200xf32> to vector<40x200xbf16>
    %c0_17 = arith.constant 0 : index
    %c0_18 = arith.constant 0 : index
    %51 = vector.load %arg4[%c0_17, %c0_18] : memref<200x128xbf16, #tpu.memory_space<vmem>>, vector<200x128xbf16>
    %cst_19 = arith.constant dense<0.000000e+00> : vector<40x128xf32>
    %52 = tpu.matmul %50, %51, %cst_19 {dimension_numbers = #tpu.dot_dimension_numbers<[1], [0], [0], [1], [0, 0, 1, 1], [], []>} : vector<40x200xbf16>, vector<200x128xbf16>, vector<40x128xf32> -> vector<40x128xf32>
    %c0_20 = arith.constant 0 : index
    %c0_21 = arith.constant 0 : index
    %53 = vector.load %arg5[%c0_20, %c0_21] : memref<1x128xf32, #tpu.memory_space<vmem>>, vector<1x128xf32>
    %54 = vector.broadcast %53 : vector<1x128xf32> to vector<40x128xf32>
    %55 = arith.addf %52, %54 : vector<40x128xf32>
    %cst_22 = arith.constant 0.000000e+00 : f32
    %56 = vector.broadcast %cst_22 : f32 to vector<8x128xf32>
    %cst_23 = arith.constant 0.000000e+00 : f32
    %57 = vector.broadcast %cst_23 : f32 to vector<8x128xf32>
    %58 = vector.extract_strided_slice %55 {offsets = [0, 0], sizes = [8, 128], strides = [1, 1]} : vector<40x128xf32> to vector<8x128xf32>
    %cst_24 = arith.constant 0.949999988 : f32
    %59 = vector.broadcast %cst_24 : f32 to vector<8x128xf32>
    %60 = arith.mulf %59, %56 : vector<8x128xf32>
    %61 = arith.addf %60, %58 : vector<8x128xf32>
    %62 = arith.subf %61, %57 : vector<8x128xf32>
    %cst_25 = arith.constant 1.000000e+00 : f32
    %63 = vector.broadcast %cst_25 : f32 to vector<8x128xf32>
    %64 = arith.cmpf ogt, %62, %63 : vector<8x128xf32>
    %65 = arith.extui %64 : vector<8x128xi1> to vector<8x128xi32>
    %66 = arith.sitofp %65 : vector<8x128xi32> to vector<8x128xf32>
    %c0_26 = arith.constant 0 : index
    %c0_27 = arith.constant 0 : index
    %c0_28 = arith.constant 0 : index
    %c0_29 = arith.constant 0 : index
    %67 = vector.load %arg6[%c0_26, %c0_27, %c0_28, %c0_29] : memref<2x5x8x128xf32, #tpu.memory_space<vmem>>, vector<1x1x8x128xf32>
    %68 = vector.shape_cast %67 : vector<1x1x8x128xf32> to vector<8x128xf32>
    %69 = vector.shape_cast %66 : vector<8x128xf32> to vector<1x1x8x128xf32>
    tpu.vector_store %arg6[%c0_26, %c0_27, %c0_28, %c0_29], %69 {strides = array<i32>} : memref<2x5x8x128xf32, #tpu.memory_space<vmem>>, vector<1x1x8x128xf32>,
    %c1 = arith.constant 1 : index
    %c0_30 = arith.constant 0 : index
    %c0_31 = arith.constant 0 : index
    %c0_32 = arith.constant 0 : index
    %70 = vector.load %arg6[%c1, %c0_30, %c0_31, %c0_32] : memref<2x5x8x128xf32, #tpu.memory_space<vmem>>, vector<1x1x8x128xf32>
    %71 = vector.shape_cast %70 : vector<1x1x8x128xf32> to vector<8x128xf32>
    %72 = vector.shape_cast %62 : vector<8x128xf32> to vector<1x1x8x128xf32>
    tpu.vector_store %arg6[%c1, %c0_30, %c0_31, %c0_32], %72 {strides = array<i32>} : memref<2x5x8x128xf32, #tpu.memory_space<vmem>>, vector<1x1x8x128xf32>,
    %73 = vector.extract_strided_slice %55 {offsets = [8, 0], sizes = [8, 128], strides = [1, 1]} : vector<40x128xf32> to vector<8x128xf32>
    %cst_33 = arith.constant 0.949999988 : f32
    %74 = vector.broadcast %cst_33 : f32 to vector<8x128xf32>
    %75 = arith.mulf %74, %62 : vector<8x128xf32>
    %76 = arith.addf %75, %73 : vector<8x128xf32>
    %77 = arith.subf %76, %66 : vector<8x128xf32>
    %cst_34 = arith.constant 1.000000e+00 : f32
    %78 = vector.broadcast %cst_34 : f32 to vector<8x128xf32>
    %79 = arith.cmpf ogt, %77, %78 : vector<8x128xf32>
    %80 = arith.extui %79 : vector<8x128xi1> to vector<8x128xi32>
    %81 = arith.sitofp %80 : vector<8x128xi32> to vector<8x128xf32>
    %c0_35 = arith.constant 0 : index
    %c1_36 = arith.constant 1 : index
    %c0_37 = arith.constant 0 : index
    %c0_38 = arith.constant 0 : index
    %82 = vector.load %arg6[%c0_35, %c1_36, %c0_37, %c0_38] : memref<2x5x8x128xf32, #tpu.memory_space<vmem>>, vector<1x1x8x128xf32>
    %83 = vector.shape_cast %82 : vector<1x1x8x128xf32> to vector<8x128xf32>
    %84 = vector.shape_cast %81 : vector<8x128xf32> to vector<1x1x8x128xf32>
    tpu.vector_store %arg6[%c0_35, %c1_36, %c0_37, %c0_38], %84 {strides = array<i32>} : memref<2x5x8x128xf32, #tpu.memory_space<vmem>>, vector<1x1x8x128xf32>,
    %c1_39 = arith.constant 1 : index
    %c1_40 = arith.constant 1 : index
    %c0_41 = arith.constant 0 : index
    %c0_42 = arith.constant 0 : index
    %85 = vector.load %arg6[%c1_39, %c1_40, %c0_41, %c0_42] : memref<2x5x8x128xf32, #tpu.memory_space<vmem>>, vector<1x1x8x128xf32>
    %86 = vector.shape_cast %85 : vector<1x1x8x128xf32> to vector<8x128xf32>
    %87 = vector.shape_cast %77 : vector<8x128xf32> to vector<1x1x8x128xf32>
    tpu.vector_store %arg6[%c1_39, %c1_40, %c0_41, %c0_42], %87 {strides = array<i32>} : memref<2x5x8x128xf32, #tpu.memory_space<vmem>>, vector<1x1x8x128xf32>,
    %88 = vector.extract_strided_slice %55 {offsets = [16, 0], sizes = [8, 128], strides = [1, 1]} : vector<40x128xf32> to vector<8x128xf32>
    %cst_43 = arith.constant 0.949999988 : f32
    %89 = vector.broadcast %cst_43 : f32 to vector<8x128xf32>
    %90 = arith.mulf %89, %77 : vector<8x128xf32>
    %91 = arith.addf %90, %88 : vector<8x128xf32>
    %92 = arith.subf %91, %81 : vector<8x128xf32>
    %cst_44 = arith.constant 1.000000e+00 : f32
    %93 = vector.broadcast %cst_44 : f32 to vector<8x128xf32>
    %94 = arith.cmpf ogt, %92, %93 : vector<8x128xf32>
    %95 = arith.extui %94 : vector<8x128xi1> to vector<8x128xi32>
    %96 = arith.sitofp %95 : vector<8x128xi32> to vector<8x128xf32>
    %c0_45 = arith.constant 0 : index
    %c2 = arith.constant 2 : index
    %c0_46 = arith.constant 0 : index
    %c0_47 = arith.constant 0 : index
    %97 = vector.load %arg6[%c0_45, %c2, %c0_46, %c0_47] : memref<2x5x8x128xf32, #tpu.memory_space<vmem>>, vector<1x1x8x128xf32>
    %98 = vector.shape_cast %97 : vector<1x1x8x128xf32> to vector<8x128xf32>
    %99 = vector.shape_cast %96 : vector<8x128xf32> to vector<1x1x8x128xf32>
    tpu.vector_store %arg6[%c0_45, %c2, %c0_46, %c0_47], %99 {strides = array<i32>} : memref<2x5x8x128xf32, #tpu.memory_space<vmem>>, vector<1x1x8x128xf32>,
    %c1_48 = arith.constant 1 : index
    %c2_49 = arith.constant 2 : index
    %c0_50 = arith.constant 0 : index
    %c0_51 = arith.constant 0 : index
    %100 = vector.load %arg6[%c1_48, %c2_49, %c0_50, %c0_51] : memref<2x5x8x128xf32, #tpu.memory_space<vmem>>, vector<1x1x8x128xf32>
    %101 = vector.shape_cast %100 : vector<1x1x8x128xf32> to vector<8x128xf32>
    %102 = vector.shape_cast %92 : vector<8x128xf32> to vector<1x1x8x128xf32>
    tpu.vector_store %arg6[%c1_48, %c2_49, %c0_50, %c0_51], %102 {strides = array<i32>} : memref<2x5x8x128xf32, #tpu.memory_space<vmem>>, vector<1x1x8x128xf32>,
    %103 = vector.extract_strided_slice %55 {offsets = [24, 0], sizes = [8, 128], strides = [1, 1]} : vector<40x128xf32> to vector<8x128xf32>
    %cst_52 = arith.constant 0.949999988 : f32
    %104 = vector.broadcast %cst_52 : f32 to vector<8x128xf32>
    %105 = arith.mulf %104, %92 : vector<8x128xf32>
    %106 = arith.addf %105, %103 : vector<8x128xf32>
    %107 = arith.subf %106, %96 : vector<8x128xf32>
    %cst_53 = arith.constant 1.000000e+00 : f32
    %108 = vector.broadcast %cst_53 : f32 to vector<8x128xf32>
    %109 = arith.cmpf ogt, %107, %108 : vector<8x128xf32>
    %110 = arith.extui %109 : vector<8x128xi1> to vector<8x128xi32>
    %111 = arith.sitofp %110 : vector<8x128xi32> to vector<8x128xf32>
    %c0_54 = arith.constant 0 : index
    %c3 = arith.constant 3 : index
    %c0_55 = arith.constant 0 : index
    %c0_56 = arith.constant 0 : index
    %112 = vector.load %arg6[%c0_54, %c3, %c0_55, %c0_56] : memref<2x5x8x128xf32, #tpu.memory_space<vmem>>, vector<1x1x8x128xf32>
    %113 = vector.shape_cast %112 : vector<1x1x8x128xf32> to vector<8x128xf32>
    %114 = vector.shape_cast %111 : vector<8x128xf32> to vector<1x1x8x128xf32>
    tpu.vector_store %arg6[%c0_54, %c3, %c0_55, %c0_56], %114 {strides = array<i32>} : memref<2x5x8x128xf32, #tpu.memory_space<vmem>>, vector<1x1x8x128xf32>,
    %c1_57 = arith.constant 1 : index
    %c3_58 = arith.constant 3 : index
    %c0_59 = arith.constant 0 : index
    %c0_60 = arith.constant 0 : index
    %115 = vector.load %arg6[%c1_57, %c3_58, %c0_59, %c0_60] : memref<2x5x8x128xf32, #tpu.memory_space<vmem>>, vector<1x1x8x128xf32>
    %116 = vector.shape_cast %115 : vector<1x1x8x128xf32> to vector<8x128xf32>
    %117 = vector.shape_cast %107 : vector<8x128xf32> to vector<1x1x8x128xf32>
    tpu.vector_store %arg6[%c1_57, %c3_58, %c0_59, %c0_60], %117 {strides = array<i32>} : memref<2x5x8x128xf32, #tpu.memory_space<vmem>>, vector<1x1x8x128xf32>,
    %118 = vector.extract_strided_slice %55 {offsets = [32, 0], sizes = [8, 128], strides = [1, 1]} : vector<40x128xf32> to vector<8x128xf32>
    %cst_61 = arith.constant 0.949999988 : f32
    %119 = vector.broadcast %cst_61 : f32 to vector<8x128xf32>
    %120 = arith.mulf %119, %107 : vector<8x128xf32>
    %121 = arith.addf %120, %118 : vector<8x128xf32>
    %122 = arith.subf %121, %111 : vector<8x128xf32>
    %cst_62 = arith.constant 1.000000e+00 : f32
    %123 = vector.broadcast %cst_62 : f32 to vector<8x128xf32>
    %124 = arith.cmpf ogt, %122, %123 : vector<8x128xf32>
    %125 = arith.extui %124 : vector<8x128xi1> to vector<8x128xi32>
    %126 = arith.sitofp %125 : vector<8x128xi32> to vector<8x128xf32>
    %c0_63 = arith.constant 0 : index
    %c4 = arith.constant 4 : index
    %c0_64 = arith.constant 0 : index
    %c0_65 = arith.constant 0 : index
    %127 = vector.load %arg6[%c0_63, %c4, %c0_64, %c0_65] : memref<2x5x8x128xf32, #tpu.memory_space<vmem>>, vector<1x1x8x128xf32>
    %128 = vector.shape_cast %127 : vector<1x1x8x128xf32> to vector<8x128xf32>
    %129 = vector.shape_cast %126 : vector<8x128xf32> to vector<1x1x8x128xf32>
    tpu.vector_store %arg6[%c0_63, %c4, %c0_64, %c0_65], %129 {strides = array<i32>} : memref<2x5x8x128xf32, #tpu.memory_space<vmem>>, vector<1x1x8x128xf32>,
    %c1_66 = arith.constant 1 : index
    %c4_67 = arith.constant 4 : index
    %c0_68 = arith.constant 0 : index
    %c0_69 = arith.constant 0 : index
    %130 = vector.load %arg6[%c1_66, %c4_67, %c0_68, %c0_69] : memref<2x5x8x128xf32, #tpu.memory_space<vmem>>, vector<1x1x8x128xf32>
    %131 = vector.shape_cast %130 : vector<1x1x8x128xf32> to vector<8x128xf32>
    %132 = vector.shape_cast %122 : vector<8x128xf32> to vector<1x1x8x128xf32>
    tpu.vector_store %arg6[%c1_66, %c4_67, %c0_68, %c0_69], %132 {strides = array<i32>} : memref<2x5x8x128xf32, #tpu.memory_space<vmem>>, vector<1x1x8x128xf32>,
    return
  }
  func.func @transform_0(%arg0: i32) -> (i32, i32) {
    %c0_i32 = arith.constant 0 : i32
    %c0_i32_0 = arith.constant 0 : i32
    return %arg0, %c0_i32 : i32, i32
  }
  func.func @transform_1(%arg0: i32) -> (i32, i32) {
    %c0_i32 = arith.constant 0 : i32
    %c0_i32_0 = arith.constant 0 : i32
    %c0_i32_1 = arith.constant 0 : i32
    return %c0_i32, %c0_i32_0 : i32, i32
  }
  func.func @transform_2(%arg0: i32) -> (i32, i32) {
    %c0_i32 = arith.constant 0 : i32
    %c0_i32_0 = arith.constant 0 : i32
    %c0_i32_1 = arith.constant 0 : i32
    return %c0_i32, %c0_i32_0 : i32, i32
  }
  func.func @transform_3(%arg0: i32) -> (i32, i32) {
    %c0_i32 = arith.constant 0 : i32
    %c0_i32_0 = arith.constant 0 : i32
    %c0_i32_1 = arith.constant 0 : i32
    return %c0_i32, %c0_i32_0 : i32, i32
  }
  func.func @transform_4(%arg0: i32) -> (i32, i32) {
    %c0_i32 = arith.constant 0 : i32
    %c0_i32_0 = arith.constant 0 : i32
    %c0_i32_1 = arith.constant 0 : i32
    return %c0_i32, %c0_i32_0 : i32, i32
  }
  func.func @transform_5(%arg0: i32) -> (i32, i32, i32, i32) {
    %c0_i32 = arith.constant 0 : i32
    %c0_i32_0 = arith.constant 0 : i32
    %c0_i32_1 = arith.constant 0 : i32
    %c0_i32_2 = arith.constant 0 : i32
    return %c0_i32, %c0_i32_0, %arg0, %c0_i32_1 : i32, i32, i32, i32
  }
}

</mosaic_0001>

<bundles_post_ra>
// kernel: tpu_custom_call.1
= control target key start
LH: loop header
LB: loop body
LE: loop exit
PB: predicated region body
PF: predicated region fallthrough
CT: control target
= control target key end

     0   :  { %s1888_s0 = inlined_call_operand.vmem [shape: f32[8,784], index: 0, kind: input, shape index: {}]   ;;  %s1889_s1 = inlined_call_operand.vmem [shape: bf16[784,200], index: 1, kind: input, shape index: {}]   ;;  %s1890_s2 = inlined_call_operand.vmem [shape: f32[1,200], index: 2, kind: input, shape index: {}]   ;;  %s1891_s3 = inlined_call_operand.vmem [shape: bf16[200,128], index: 3, kind: input, shape index: {}]   ;;  %s1892_s4 = inlined_call_operand.vmem [shape: f32[1,128], index: 4, kind: input, shape index: {}]   ;;  %s1893_s5 = inlined_call_operand.hbm [shape: f32[2,5,8,128], index: 5, kind: output, shape index: {}]  }
   0x1   :  { %v1261_v0 = vld [vmem:[%s1889_s1 + $0x104] ss:$8 sps:$4 sm:$0xff]   ;;  %v1263_v1 = vld [vmem:[%s1889_s1 + $0x100] ss:$8 sps:$4 sm:$0xff]   ;;  %v1264_v2 = vld [vmem:[%s1889_s1 + $0x114] ss:$8 sps:$4 sm:$0xff]  }
   0x2   :  { %681 = vmatprep.subr.bf16.mxu0 %v1261_v0  ;;  %v1266_v3 = vld [vmem:[%s1889_s1 + $0x110] ss:$8 sps:$4 sm:$0xff]   ;;  %v1267_v4 = vld [vmem:[%s1889_s1 + $0x124] ss:$8 sps:$4 sm:$0xff]   ;;  %v1269_v5 = vld [vmem:[%s1889_s1 + $0x120] ss:$8 sps:$4 sm:$0xff]  }
   0x3   :  { %682 = vmatpush1.bf16.msra.mxu0 %v1263_v1  ;;  %v1270_v6 = vld [vmem:[%s1889_s1 + $0x134] ss:$8 sps:$4 sm:$0xff]   ;;  %v1272_v7 = vld [vmem:[%s1889_s1 + $0x130] ss:$8 sps:$4 sm:$0xff]   ;;  %v1273_v8 = vld [vmem:[%s1889_s1 + $0x144] ss:$8 sps:$4 sm:$0xff]  }
   0x4   :  { %683 = vmatprep.subr.bf16.mxu0 %v1264_v2  ;;  %v1275_v9 = vld [vmem:[%s1889_s1 + $0x140] ss:$8 sps:$4 sm:$0xff]   ;;  %v1276_v10 = vld [vmem:[%s1889_s1 + $0x154] ss:$8 sps:$4 sm:$0xff]   ;;  %v1278_v11 = vld [vmem:[%s1889_s1 + $0x150] ss:$8 sps:$4 sm:$0xff]  }
   0x5   :  { %v1279_v12 = vld [vmem:[%s1889_s1 + $0x164] ss:$8 sps:$4 sm:$0xff]   ;;  %v25_v13 = vld [vmem:[%s1888_s0 + $0x18] sm:$0xff]  ;;  %v1281_v15 = vld [vmem:[%s1889_s1 + $0x160] ss:$8 sps:$4 sm:$0xff]  }
   0x6   :  { %v32_v14 = vpack.c.bf16 %v25_v13, %v25_v13  ;;  %v1282_v16 = vld [vmem:[%s1889_s1 + $0x174] ss:$8 sps:$4 sm:$0xff]   ;;  %v1315_v17 = vld [vmem:[%s1889_s1 + $0x4] ss:$8 sps:$4 sm:$0xff]   ;;  %v1284_v18 = vld [vmem:[%s1889_s1 + $0x170] ss:$8 sps:$4 sm:$0xff]  }
   0x7   :  { %684 = vmatpush1.bf16.msra.mxu0 %v1266_v3  ;;  %v1285_v19 = vld [vmem:[%s1889_s1 + $0x184] ss:$8 sps:$4 sm:$0xff]   ;;  %640 = vmatprep.subr.bf16.mxu1 %v1315_v17  ;;  %v1320_v20 = vld [vmem:[%s1889_s1] ss:$8 sps:$4 sm:$0xff]   ;;  %v1321_v21 = vld [vmem:[%s1889_s1 + $0x14] ss:$8 sps:$4 sm:$0xff]  }
   0x8   :  { %685 = vmatprep.subr.bf16.mxu0 %v1267_v4  ;;  %713 = vmatprep.mubr.bf16.mxu0 %v32_v14  ;;  %v1326_v22 = vld [vmem:[%s1889_s1 + $0x10] ss:$8 sps:$4 sm:$0xff]   ;;  %v1327_v23 = vld [vmem:[%s1889_s1 + $0x24] ss:$8 sps:$4 sm:$0xff]   ;;  %v1287_v24 = vld [vmem:[%s1889_s1 + $0x180] ss:$8 sps:$4 sm:$0xff]  }
   0x9   :  { %641 = vmatpush1.bf16.msra.mxu1 %v1320_v20  ;;  %v1288_v25 = vld [vmem:[%s1889_s1 + $0x194] ss:$8 sps:$4 sm:$0xff]   ;;  %v1332_v26 = vld [vmem:[%s1889_s1 + $0x20] ss:$8 sps:$4 sm:$0xff]   ;;  %v1290_v28 = vld [vmem:[%s1889_s1 + $0x190] ss:$8 sps:$4 sm:$0xff]  }
   0xa   :  { %642 = vmatprep.subr.bf16.mxu1 %v1321_v21  ;;  %v1333_v27 = vld [vmem:[%s1889_s1 + $0x34] ss:$8 sps:$4 sm:$0xff]   ;;  %v1291_v29 = vld [vmem:[%s1889_s1 + $0x1a4] ss:$8 sps:$4 sm:$0xff]   ;;  %v1338_v30 = vld [vmem:[%s1889_s1 + $0x30] ss:$8 sps:$4 sm:$0xff]  }
   0xb   :  { %686 = vmatpush1.bf16.msra.mxu0 %v1269_v5  ;;  %v1339_v31 = vld [vmem:[%s1889_s1 + $0x44] ss:$8 sps:$4 sm:$0xff]   ;;  %v1293_v32 = vld [vmem:[%s1889_s1 + $0x1a0] ss:$8 sps:$4 sm:$0xff]   ;;  %v1294_v33 = vld [vmem:[%s1889_s1 + $0x1b4] ss:$8 sps:$4 sm:$0xff]  }
   0xc   :  { %687 = vmatprep.subr.bf16.mxu0 %v1270_v6  ;;  %v1344_v34 = vld [vmem:[%s1889_s1 + $0x40] ss:$8 sps:$4 sm:$0xff]   ;;  %v1345_v35 = vld [vmem:[%s1889_s1 + $0x54] ss:$8 sps:$4 sm:$0xff]   ;;  %v1296_v36 = vld [vmem:[%s1889_s1 + $0x1b0] ss:$8 sps:$4 sm:$0xff]  }
   0xd   :  { %643 = vmatpush1.bf16.msra.mxu1 %v1326_v22  ;;  %v1297_v37 = vld [vmem:[%s1889_s1 + $0x1c4] ss:$8 sps:$4 sm:$0xff]   ;;  %v1350_v38 = vld [vmem:[%s1889_s1 + $0x50] ss:$8 sps:$4 sm:$0xff]   ;;  %v1299_v40 = vld [vmem:[%s1889_s1 + $0x1c0] ss:$8 sps:$4 sm:$0xff]  }
   0xe   :  { %644 = vmatprep.subr.bf16.mxu1 %v1327_v23  ;;  %v1351_v39 = vld [vmem:[%s1889_s1 + $0x64] ss:$8 sps:$4 sm:$0xff]   ;;  %v1300_v41 = vld [vmem:[%s1889_s1 + $0x1d4] ss:$8 sps:$4 sm:$0xff]   ;;  %v1356_v42 = vld [vmem:[%s1889_s1 + $0x60] ss:$8 sps:$4 sm:$0xff]  }
   0xf   :  { %688 = vmatpush1.bf16.msra.mxu0 %v1272_v7  ;;  %v1357_v43 = vld [vmem:[%s1889_s1 + $0x74] ss:$8 sps:$4 sm:$0xff]   ;;  %v1302_v44 = vld [vmem:[%s1889_s1 + $0x1d0] ss:$8 sps:$4 sm:$0xff]   ;;  %v1303_v45 = vld [vmem:[%s1889_s1 + $0x1e4] ss:$8 sps:$4 sm:$0xff]  }
  0x10   :  { %689 = vmatprep.subr.bf16.mxu0 %v1273_v8  ;;  %v1362_v46 = vld [vmem:[%s1889_s1 + $0x70] ss:$8 sps:$4 sm:$0xff]   ;;  %v1363_v47 = vld [vmem:[%s1889_s1 + $0x84] ss:$8 sps:$4 sm:$0xff]   ;;  %v1305_v48 = vld [vmem:[%s1889_s1 + $0x1e0] ss:$8 sps:$4 sm:$0xff]  }
  0x11   :  { %645 = vmatpush1.bf16.msra.mxu1 %v1332_v26  ;;  %v1306_v49 = vld [vmem:[%s1889_s1 + $0x1f4] ss:$8 sps:$4 sm:$0xff]   ;;  %v1368_v50 = vld [vmem:[%s1889_s1 + $0x80] ss:$8 sps:$4 sm:$0xff]   ;;  %v1308_v51 = vld [vmem:[%s1889_s1 + $0x1f0] ss:$8 sps:$4 sm:$0xff]  }
  0x12   :  { %646 = vmatprep.subr.bf16.mxu1 %v1333_v27  ;;  %v1369_v52 = vld [vmem:[%s1889_s1 + $0x94] ss:$8 sps:$4 sm:$0xff]   ;;  %v1311_v54 = vld [vmem:[%s1889_s1 + $0x204] ss:$8 sps:$4 sm:$0xff]   ;;  %v1374_v55 = vld [vmem:[%s1889_s1 + $0x90] ss:$8 sps:$4 sm:$0xff]  }
  0x13   :  { %690 = vmatpush1.bf16.msra.mxu0 %v1275_v9  ;;  %v24_v53 = vld [vmem:[%s1888_s0 + $0x10] sm:$0xff]  ;;  %v1375_v56 = vld [vmem:[%s1889_s1 + $0xa4] ss:$8 sps:$4 sm:$0xff]   ;;  %v1309_v59 = vld [vmem:[%s1889_s1 + $0x200] ss:$8 sps:$4 sm:$0xff]  }
  0x14   :  { %691 = vmatprep.subr.bf16.mxu0 %v1276_v10  ;;  %v31_v57 = vpack.c.bf16 %v24_v53, %v24_v53  ;;  %v27_v58 = vld [vmem:[%s1888_s0 + $0x28] sm:$0xff]  ;;  %v1314_v61 = vld [vmem:[%s1889_s1 + $0x214] ss:$8 sps:$4 sm:$0xff]   ;;  %v1312_v1 = vld [vmem:[%s1889_s1 + $0x210] ss:$8 sps:$4 sm:$0xff]  }
  0x15   :  { %647 = vmatpush1.bf16.msra.mxu1 %v1338_v30  ;;  %v34_v60 = vpack.c.bf16 %v27_v58, %v27_v58  ;;  %v1380_v62 = vld [vmem:[%s1889_s1 + $0xa0] ss:$8 sps:$4 sm:$0xff]   ;;  %v1381_v63 = vld [vmem:[%s1889_s1 + $0xb4] ss:$8 sps:$4 sm:$0xff]   ;;  %v1319_v3 = vld [vmem:[%s1889_s1 + $0x224] ss:$8 sps:$4 sm:$0xff]  }
  0x16   :  { %648 = vmatprep.subr.bf16.mxu1 %v1339_v31  ;;  %v23_v0 = vld [vmem:[%s1888_s0 + $0x8] sm:$0xff]  ;;  %v1386_v4 = vld [vmem:[%s1889_s1 + $0xb0] ss:$8 sps:$4 sm:$0xff]   ;;  %v1325_v7 = vld [vmem:[%s1889_s1 + $0x234] ss:$8 sps:$4 sm:$0xff]  }
  0x17   :  { %692 = vmatpush1.bf16.msra.mxu0 %v1278_v11  ;;  %v30_v2 = vpack.c.bf16 %v23_v0, %v23_v0  ;;  %v1387_v5 = vld [vmem:[%s1889_s1 + $0xc4] ss:$8 sps:$4 sm:$0xff]   ;;  %v1317_v6 = vld [vmem:[%s1889_s1 + $0x220] ss:$8 sps:$4 sm:$0xff]   ;;  %v1323_v8 = vld [vmem:[%s1889_s1 + $0x230] ss:$8 sps:$4 sm:$0xff]  }
  0x18   :  { %693 = vmatprep.subr.bf16.mxu0 %v1279_v12  ;;  %v1392_v9 = vld [vmem:[%s1889_s1 + $0xc0] ss:$8 sps:$4 sm:$0xff]   ;;  %v1393_v10 = vld [vmem:[%s1889_s1 + $0xd4] ss:$8 sps:$4 sm:$0xff]   ;;  %v1331_v11 = vld [vmem:[%s1889_s1 + $0x244] ss:$8 sps:$4 sm:$0xff]  }
  0x19   :  { %649 = vmatpush1.bf16.msra.mxu1 %v1344_v34  ;;  %672 = vmatprep.mubr.bf16.mxu1 %v30_v2  ;;  %v1398_v12 = vld [vmem:[%s1889_s1 + $0xd0] ss:$8 sps:$4 sm:$0xff]   ;;  %v1399_v13 = vld [vmem:[%s1889_s1 + $0xe4] ss:$8 sps:$4 sm:$0xff]   ;;  %v1329_v14 = vld [vmem:[%s1889_s1 + $0x240] ss:$8 sps:$4 sm:$0xff]  }
  0x1a   :  { %650 = vmatprep.subr.bf16.mxu1 %v1345_v35 }
  0x1b   :  { %694 = vmatpush1.bf16.msra.mxu0 %v1281_v15 }
  0x1c   :  { %695 = vmatprep.subr.bf16.mxu0 %v1282_v16 }
  0x1d   :  { %651 = vmatpush1.bf16.msra.mxu1 %v1350_v38 }
  0x1e   :  { %652 = vmatprep.subr.bf16.mxu1 %v1351_v39 }
  0x1f   :  { %696 = vmatpush1.bf16.msra.mxu0 %v1284_v18 }
  0x20   :  { %697 = vmatprep.subr.bf16.mxu0 %v1285_v19 }
  0x21   :  { %653 = vmatpush1.bf16.msra.mxu1 %v1356_v42 }
  0x22   :  { %654 = vmatprep.subr.bf16.mxu1 %v1357_v43 }
  0x23   :  { %698 = vmatpush1.bf16.msra.mxu0 %v1287_v24 }
  0x24   :  { %699 = vmatprep.subr.bf16.mxu0 %v1288_v25 }
  0x25   :  { %655 = vmatpush1.bf16.msra.mxu1 %v1362_v46 }
  0x26   :  { %656 = vmatprep.subr.bf16.mxu1 %v1363_v47 }
  0x27   :  { %700 = vmatpush1.bf16.msra.mxu0 %v1290_v28 }
  0x28   :  { %701 = vmatprep.subr.bf16.mxu0 %v1291_v29 }
  0x29   :  { %657 = vmatpush1.bf16.msra.mxu1 %v1368_v50 }
  0x2a   :  { %658 = vmatprep.subr.bf16.mxu1 %v1369_v52 }
  0x2b   :  { %702 = vmatpush1.bf16.msra.mxu0 %v1293_v32 }
  0x2c   :  { %703 = vmatprep.subr.bf16.mxu0 %v1294_v33 }
  0x2d   :  { %659 = vmatpush1.bf16.msra.mxu1 %v1374_v55 }
  0x2e   :  { %660 = vmatprep.subr.bf16.mxu1 %v1375_v56 }
  0x2f   :  { %704 = vmatpush1.bf16.msra.mxu0 %v1296_v36 }
  0x30   :  { %705 = vmatprep.subr.bf16.mxu0 %v1297_v37 }
  0x31   :  { %661 = vmatpush1.bf16.msra.mxu1 %v1380_v62 }
  0x32   :  { %662 = vmatprep.subr.bf16.mxu1 %v1381_v63 }
  0x33   :  { %706 = vmatpush1.bf16.msra.mxu0 %v1299_v40 }
  0x34   :  { %707 = vmatprep.subr.bf16.mxu0 %v1300_v41 }
  0x35   :  { %663 = vmatpush1.bf16.msra.mxu1 %v1386_v4 }
  0x36   :  { %664 = vmatprep.subr.bf16.mxu1 %v1387_v5 }
  0x37   :  { %708 = vmatpush1.bf16.msra.mxu0 %v1302_v44 }
  0x38   :  { %709 = vmatprep.subr.bf16.mxu0 %v1303_v45 }
  0x39   :  { %665 = vmatpush1.bf16.msra.mxu1 %v1392_v9 }
  0x3a   :  { %666 = vmatprep.subr.bf16.mxu1 %v1393_v10 }
  0x3b   :  { %710 = vmatpush1.bf16.msra.mxu0 %v1305_v48 }
  0x3c   :  { %711 = vmatprep.subr.bf16.mxu0 %v1306_v49 }
  0x3f   :  { %712 = vmatpush1.bf16.msra.mxu0 %v1308_v51 }
  0x40   :  { %722 = vmatprep.subr.bf16.mxu0 %v1311_v54 }
  0x42   :  { %714 = vmatmul.mubr.bf16.vlgmr.msra.gmra.mrb[0].mxu0 %v31_v57 }
  0x43   :  { %723 = vmatpush1.bf16.msra.mxu0 %v1309_v59  ;;  %754 = vmatprep.mubr.bf16.mxu0 %v34_v60 }
  0x44   :  { %724 = vmatprep.subr.bf16.mxu0 %v1314_v61 }
  0x47   :  { %725 = vmatpush1.bf16.msra.mxu0 %v1312_v1 }
  0x48   :  { %726 = vmatprep.subr.bf16.mxu0 %v1319_v3 }
  0x4b   :  { %727 = vmatpush1.bf16.msra.mxu0 %v1317_v6 }
  0x4c   :  { %728 = vmatprep.subr.bf16.mxu0 %v1325_v7 }
  0x4f   :  { %729 = vmatpush1.bf16.msra.mxu0 %v1323_v8 }
  0x50   :  { %10 = vsyncpa [#allocation3], 0  ;;  %730 = vmatprep.subr.bf16.mxu0 %v1331_v11  ;;  %v1337_v15 = vld [vmem:[%s1889_s1 + $0x254] ss:$8 sps:$4 sm:$0xff]   ;;  %667 = vmatpush1.bf16.msra.mxu1 %v1398_v12  ;;  %v1404_v16 = vld [vmem:[%s1889_s1 + $0xe0] ss:$8 sps:$4 sm:$0xff]   ;;  %v136_v3 = vlaneseq }
  0x51   :  { %668 = vmatprep.subr.bf16.mxu1 %v1399_v13  ;;  %v1405_v17 = vld [vmem:[%s1889_s1 + $0xf4] ss:$8 sps:$4 sm:$0xff]   ;;  %v1335_v18 = vld [vmem:[%s1889_s1 + $0x250] ss:$8 sps:$4 sm:$0xff]   ;;  %v1343_v19 = vld [vmem:[%s1889_s1 + $0x264] ss:$8 sps:$4 sm:$0xff]  }
  0x52   :  { %v1407_v20 = vld [vmem:[%s1889_s1 + $0xf0] ss:$8 sps:$4 sm:$0xff]   ;;  %v22_v21 = vld [vmem:[%s1888_s0] sm:$0xff]  ;;  %v1349_v23 = vld [vmem:[%s1889_s1 + $0x274] ss:$8 sps:$4 sm:$0xff]   ;;  %v1445_v26 = vmov 0  }
  0x53   :  { %731 = vmatpush1.bf16.msra.mxu0 %v1329_v14  ;;  %v1341_v22 = vld [vmem:[%s1889_s1 + $0x260] ss:$8 sps:$4 sm:$0xff]   ;;  %v29_v24 = vpack.c.bf16 %v22_v21, %v22_v21  ;;  %v1347_v27 = vld [vmem:[%s1889_s1 + $0x270] ss:$8 sps:$4 sm:$0xff]   ;;  %v1355_v28 = vld [vmem:[%s1889_s1 + $0x284] ss:$8 sps:$4 sm:$0xff]  }
  0x54   :  { %732 = vmatprep.subr.bf16.mxu0 %v1337_v15  ;;  %669 = vmatpush1.bf16.msra.mxu1 %v1404_v16  ;;  %v1408_v25 = vld [vmem:[%s1891_s3] sm:$0xff]   ;;  %v1409_v29 = vld [vmem:[%s1891_s3 + $0x8] sm:$0xff]   ;;  %v1361_v31 = vld [vmem:[%s1889_s1 + $0x294] ss:$8 sps:$4 sm:$0xff]   ;;  %vm636_vm0 = vcmask 130048   ;;  %vm983_vm1 = vcmask 1043456  }
  0x55   :  { %670 = vmatprep.subr.bf16.mxu1 %v1405_v17  ;;  %v1353_v30 = vld [vmem:[%s1889_s1 + $0x280] ss:$8 sps:$4 sm:$0xff]   ;;  %v1410_v32 = vld [vmem:[%s1891_s3 + $0x10] sm:$0xff]   ;;  %v1367_v34 = vld [vmem:[%s1889_s1 + $0x2a4] ss:$8 sps:$4 sm:$0xff]   ;;  %v137_v4 = vshrl.u32 %v136_v3, 7 }
  0x56   :  { %v1359_v33 = vld [vmem:[%s1889_s1 + $0x290] ss:$8 sps:$4 sm:$0xff]   ;;  %v1365_v36 = vld [vmem:[%s1889_s1 + $0x2a0] ss:$8 sps:$4 sm:$0xff]   ;;  %v1373_v37 = vld [vmem:[%s1889_s1 + $0x2b4] ss:$8 sps:$4 sm:$0xff]  }
  0x57   :  { %733 = vmatpush1.bf16.msra.mxu0 %v1335_v18  ;;  %v1411_v35 = vld [vmem:[%s1891_s3 + $0x18] sm:$0xff]   ;;  %v1412_v38 = vld [vmem:[%s1891_s3 + $0x20] sm:$0xff]   ;;  %v1413_v41 = vld [vmem:[%s1891_s3 + $0x28] sm:$0xff]   ;;  %v138_v5 = vsub.s32 0, %v137_v4  ;;  %v142_v7 = vsub.s32 1, %v137_v4  ;;  %vm973_vm6 = vcmask 588800  }
  0x58   :  { %734 = vmatprep.subr.bf16.mxu0 %v1343_v19  ;;  %671 = vmatpush1.bf16.msra.mxu1 %v1407_v20  ;;  %v1371_v39 = vld [vmem:[%s1889_s1 + $0x2b0] ss:$8 sps:$4 sm:$0xff]   ;;  %v1379_v40 = vld [vmem:[%s1889_s1 + $0x2c4] ss:$8 sps:$4 sm:$0xff]   ;;  %v1377_v42 = vld [vmem:[%s1889_s1 + $0x2c0] ss:$8 sps:$4 sm:$0xff]  }
  0x59   :  { %987 = vmatprep.subr.bf16.mxu1 %v1445_v26  ;;  %v1385_v43 = vld [vmem:[%s1889_s1 + $0x2d4] ss:$8 sps:$4 sm:$0xff]   ;;  %v1383_v45 = vld [vmem:[%s1889_s1 + $0x2d0] ss:$8 sps:$4 sm:$0xff]   ;;  %v1391_v46 = vld [vmem:[%s1889_s1 + $0x2e4] ss:$8 sps:$4 sm:$0xff]  }
  0x5a   :  { %v1414_v44 = vld [vmem:[%s1891_s3 + $0x30] sm:$0xff]   ;;  %v1415_v47 = vld [vmem:[%s1891_s3 + $0x38] sm:$0xff]   ;;  %v1389_v48 = vld [vmem:[%s1889_s1 + $0x2e0] ss:$8 sps:$4 sm:$0xff]  }
  0x5b   :  { %735 = vmatpush1.bf16.msra.mxu0 %v1341_v22  ;;  %673 = vmatmul.mubr.bf16.vlgmr.msra.gmra.mrb[0].mxu1 %v29_v24  ;;  %v1397_v49 = vld [vmem:[%s1889_s1 + $0x2f4] ss:$8 sps:$4 sm:$0xff]   ;;  %v1395_v50 = vld [vmem:[%s1889_s1 + $0x2f0] ss:$8 sps:$4 sm:$0xff]   ;;  %v26_v51 = vld [vmem:[%s1888_s0 + $0x20] sm:$0xff]  ;;  %v1446_v22 = vmov 0.0  }
  0x5c   :  { %736 = vmatprep.subr.bf16.mxu0 %v1349_v23  ;;  %988 = vmatpush1.bf16.msra.mxu1 %v1408_v25  ;;  %v1403_v52 = vld [vmem:[%s1889_s1 + $0x304] ss:$8 sps:$4 sm:$0xff]   ;;  %v33_v53 = vpack.c.bf16 %v26_v51, %v26_v51  ;;  %v1401_v54 = vld [vmem:[%s1889_s1 + $0x300] ss:$8 sps:$4 sm:$0xff]   ;;  %v28_v55 = vld [vmem:[%s1888_s0 + $0x30] sm:$0xff] }
  0x5d   :  { %989 = vmatprep.subr.bf16.mxu1 %v1445_v26  ;;  %v35_v56 = vpack.c.bf16 %v28_v55, %v28_v55  ;;  %v1416_v57 = vld [vmem:[%s1891_s3 + $0x40] sm:$0xff]   ;;  %v1417_v58 = vld [vmem:[%s1891_s3 + $0x48] sm:$0xff]   ;;  %v1418_v59 = vld [vmem:[%s1891_s3 + $0x50] sm:$0xff]  }
  0x5e   :  { %v1419_v60 = vld [vmem:[%s1891_s3 + $0x58] sm:$0xff]   ;;  %v1420_v61 = vld [vmem:[%s1891_s3 + $0x60] ss:$0 sps:$4 sm:$0xff]  }
  0x5f   :  { %737 = vmatpush1.bf16.msra.mxu0 %v1347_v27  ;;  %v985_v62 = vsel %vm983_vm1, %v1420_v61, 0  ;;  %v134_v6 = vld [vmem:[%s1890_s2] sm:$0x3] }
  0x60   :  { %738 = vmatprep.subr.bf16.mxu0 %v1355_v28  ;;  %990 = vmatpush1.bf16.msra.mxu1 %v1409_v29  ;;  %v139_v8 = vrot.slane %v134_v6, %v138_v5  ;;  %v143_v9 = vrot.slane %v134_v6, %v142_v7 }
  0x61   :  { %991 = vmatprep.subr.bf16.mxu1 %v1445_v26 }
  0x63   :  { %739 = vmatpush1.bf16.msra.mxu0 %v1353_v30 }
  0x64   :  { %740 = vmatprep.subr.bf16.mxu0 %v1361_v31  ;;  %992 = vmatpush1.bf16.msra.mxu1 %v1410_v32 }
  0x65   :  { %993 = vmatprep.subr.bf16.mxu1 %v1445_v26 }
  0x67   :  { %741 = vmatpush1.bf16.msra.mxu0 %v1359_v33 }
  0x68   :  { %742 = vmatprep.subr.bf16.mxu0 %v1367_v34  ;;  %994 = vmatpush1.bf16.msra.mxu1 %v1411_v35 }
  0x69   :  { %995 = vmatprep.subr.bf16.mxu1 %v1445_v26 }
  0x6b   :  { %743 = vmatpush1.bf16.msra.mxu0 %v1365_v36  ;;  %v1447_v36 = vmov 1.0|1.0  }
  0x6c   :  { %744 = vmatprep.subr.bf16.mxu0 %v1373_v37  ;;  %996 = vmatpush1.bf16.msra.mxu1 %v1412_v38 }
  0x6d   :  { %997 = vmatprep.subr.bf16.mxu1 %v1445_v26 }
  0x6f   :  { %745 = vmatpush1.bf16.msra.mxu0 %v1371_v39 }
  0x70   :  { %746 = vmatprep.subr.bf16.mxu0 %v1379_v40  ;;  %998 = vmatpush1.bf16.msra.mxu1 %v1413_v41 }
  0x71   :  { %999 = vmatprep.subr.bf16.mxu1 %v1445_v26 }
  0x73   :  { %747 = vmatpush1.bf16.msra.mxu0 %v1377_v42 }
  0x74   :  { %748 = vmatprep.subr.bf16.mxu0 %v1385_v43  ;;  %1000 = vmatpush1.bf16.msra.mxu1 %v1414_v44 }
  0x75   :  { %1001 = vmatprep.subr.bf16.mxu1 %v1445_v26 }
  0x77   :  { %749 = vmatpush1.bf16.msra.mxu0 %v1383_v45 }
  0x78   :  { %750 = vmatprep.subr.bf16.mxu0 %v1391_v46  ;;  %1002 = vmatpush1.bf16.msra.mxu1 %v1415_v47 }
  0x79   :  { %1003 = vmatprep.subr.bf16.mxu1 %v1445_v26 }
  0x7b   :  { %751 = vmatpush1.bf16.msra.mxu0 %v1389_v48 }
  0x7c   :  { %752 = vmatprep.subr.bf16.mxu0 %v1397_v49  ;;  %1004 = vmatpush1.bf16.msra.mxu1 %v1416_v57 }
  0x7d   :  { %1005 = vmatprep.subr.bf16.mxu1 %v1445_v26 }
  0x7f   :  { %753 = vmatpush1.bf16.msra.mxu0 %v1395_v50 }
  0x80   :  { %763 = vmatprep.subr.bf16.mxu0 %v1403_v52  ;;  %1006 = vmatpush1.bf16.msra.mxu1 %v1417_v58 }
  0x81   :  { %1007 = vmatprep.subr.bf16.mxu1 %v1445_v26 }
  0x82   :  { %755 = vmatmul.mubr.bf16.vlgmr.msra.gmra.mrb[0].mxu0 %v33_v53 }
  0x83   :  { %764 = vmatpush1.bf16.msra.mxu0 %v1401_v54  ;;  %795 = vmatprep.mubr.bf16.mxu0 %v1445_v26 }
  0x84   :  { %1008 = vmatpush1.bf16.msra.mxu1 %v1418_v59 }
  0x85   :  { %1009 = vmatprep.subr.bf16.mxu1 %v1445_v26 }
  0x88   :  { %1010 = vmatpush1.bf16.msra.mxu1 %v1419_v60 }
  0x89   :  { %1011 = vmatprep.subr.bf16.mxu1 %v1445_v26 }
  0x8c   :  { %1012 = vmatpush1.bf16.msra.mxu1 %v985_v62 }
  0x8e   :  { %1204 = vmatmul.mubr.msk.bf16.vlgmr.msra.gmra.mrb[0].mxu0 %vm636_vm0, %v35_v56  ;;  %v1215_v56 = vld [vmem:[%s1892_s4] ss:$0 sm:$0xff]  ;;  %s1448_s4 = smov [#allocation2]  }
  0x8f   :  { %s1095_s29 = sshll.u32 %s1448_s4, 4  ;;  %s1096_s29 = int_to_ptr.vmem [resolvable:$true] %s1095_s29 }
  0x90   :  { %s1421_s30 = scalar_lea.vmem %s1096_s29, 1280  ;;  %p1426_p1 = scmp.lt.s32.totalorder %s1096_s29, %s1096_s29 }
  0x91   :  { %p1422_p0 = scmp.ne.s32.totalorder %s1096_s29, %s1421_s30  ;;  %p1427_p2 = scmp.lt.s32.totalorder %s1421_s30, %s1421_s30 }
  0x93   :  { %p1428_p3 = por %p1427_p2, %p1426_p1 }
  0x95   :  { %p1429_p4 = pnand %p1428_p3, %p1422_p0 }
 0x12e   :  { %v674_v63 = vpop.f32.mrb[0].mxu1 }
 0x12f   :  { %v676_v0 = vpop.f32.mrb[1].mxu1  ;;  %v675_v10 = vadd.f32 %v674_v63, %v139_v8 }
 0x130   :  { %v678_v1 = vpop.f32.mrb[2].mxu1  ;;  %v677_v11 = vadd.f32 %v676_v0, %v143_v9 }
 0x131   :  { %v679_v2 = vpop.f32.mrb[3].mxu1 }
 0x161   :  { %v797_v12 = vpop.f32.mrb[0].mxu0 }
 0x162   :  { %v1244_v13 = vadd.f32 %v797_v12, %v675_v10  ;;  %v799_v14 = vpop.f32.mrb[1].mxu0 }
 0x163   :  { %v1246_v15 = vadd.f32 %v799_v14, %v677_v11  ;;  %v801_v16 = vpop.f32.mrb[2].mxu0 }
 0x164   :  { %v802_v17 = vpop.f32.mrb[3].mxu0  ;;  %vm806_vm2 = vcmp.gt.f32.partialorder %v1244_v13, 1.0  ;;  %v812_v18 = vmul.f32 0.95, %v1244_v13 }
 0x165   :  { %vm807_vm3 = vcmp.gt.f32.partialorder %v1246_v15, 1.0  ;;  %v813_v19 = vmul.f32 0.95, %v1246_v15  ;;  %v1205_v23 = vsel %vm806_vm2, 1.0, %v1446_v22 }
 0x166   :  { %v814_v20 = vadd.f32 %v1244_v13, %v812_v18  ;;  %v1206_v24 = vsel %vm807_vm3, 1.0, %v1446_v22 }
 0x167   :  { %v815_v21 = vadd.f32 %v1246_v15, %v813_v19 }
 0x168   :  { %v816_v25 = vsub.f32 %v814_v20, %v1205_v23 }
 0x169   :  { %v817_v26 = vsub.f32 %v815_v21, %v1206_v24 }
 0x16a   :  { %vm818_vm4 = vcmp.gt.f32.partialorder %v816_v25, 1.0  ;;  %v824_v27 = vmul.f32 0.95, %v816_v25 }
 0x16b   :  { %vm819_vm5 = vcmp.gt.f32.partialorder %v817_v26, 1.0  ;;  %v825_v28 = vmul.f32 0.95, %v817_v26  ;;  %v1207_v33 = vsel %vm818_vm4, 1.0, %v1446_v22  ;;  %vm1230_vm7 = vmpackc.low %vm818_vm4, %vm806_vm2 }
 0x16c   :  { %v1208_v29 = vsel %vm819_vm5, 1.0, %v1446_v22  ;;  %v826_v30 = vadd.f32 %v1244_v13, %v824_v27 }
 0x16d   :  { %v827_v31 = vadd.f32 %v1246_v15, %v825_v28  ;;  %v861_v32 = vpack.c.bf16 %v1208_v29, %v1206_v24 }
 0x16e   :  { %v828_v34 = vsub.f32 %v826_v30, %v1207_v33 }
 0x16f   :  { %v829_v35 = vsub.f32 %v827_v31, %v1208_v29  ;;  %1229 = vmatprep.mubr.msk.bf16.mxu1 %vm973_vm6, %v861_v32 }
 0x170   :  { %1231 = vmatmul.mubr.msk.bf16.vlgmr.msra.gmra.mrb[4].mxu1 %vm1230_vm7, %v1447_v36  ;;  %vm830_vm8 = vcmp.gt.f32.partialorder %v828_v34, 1.0  ;;  %v836_v37 = vmul.f32 0.95, %v828_v34 }
 0x171   :  { %v837_v38 = vmul.f32 0.95, %v829_v35  ;;  %vm831_vm9 = vcmp.gt.f32.partialorder %v829_v35, 1.0  ;;  %v1209_v41 = vsel %vm830_vm8, 1.0, %v1446_v22 }
 0x172   :  { %v838_v39 = vadd.f32 %v1244_v13, %v836_v37  ;;  %v1210_v42 = vsel %vm831_vm9, 1.0, %v1446_v22 }
 0x173   :  { %v839_v40 = vadd.f32 %v1246_v15, %v837_v38 }
 0x174   :  { %v840_v43 = vsub.f32 %v838_v39, %v1209_v41 }
 0x175   :  { %v841_v44 = vsub.f32 %v839_v40, %v1210_v42 }
 0x176   :  { %v848_v45 = vmul.f32 0.95, %v840_v43  ;;  %vm842_vm11 = vcmp.gt.f32.partialorder %v840_v43, 1.0 }
 0x177   :  { %vm843_vm10 = vcmp.gt.f32.partialorder %v841_v44, 1.0  ;;  %v849_v46 = vmul.f32 0.95, %v841_v44  ;;  %vm1233_vm12 = vmpackc.low %vm842_vm11, %vm830_vm8  ;;  %v1211_v52 = vsel %vm842_vm11, 1.0, %v1446_v22 }
 0x178   :  { %v1212_v47 = vsel %vm843_vm10, 1.0, %v1446_v22  ;;  %v850_v48 = vadd.f32 %v1244_v13, %v848_v45 }
 0x179   :  { %v863_v49 = vpack.c.bf16 %v1212_v47, %v1210_v42  ;;  %v851_v50 = vadd.f32 %v1246_v15, %v849_v46 }
 0x17a   :  { %v852_v53 = vsub.f32 %v850_v48, %v1211_v52 }
 0x17b   :  { %1232 = vmatprep.mubr.msk.bf16.mxu1 %vm973_vm6, %v863_v49  ;;  %v853_v51 = vsub.f32 %v851_v50, %v1212_v47 }
 0x17c   :  { %1234 = vmatmul.mubr.msk.bf16.gmra.mrb[8].mxu1 %vm1233_vm12, %v1447_v36  ;;  %vm854_vm14 = vcmp.gt.f32.partialorder %v852_v53, 1.0 }
 0x17d   :  { %vm855_vm13 = vcmp.gt.f32.partialorder %v853_v51, 1.0  ;;  %vm1236_vm15 = vmpackc.low %vm854_vm14, %vm854_vm14 }
 0x17e   :  { %v1214_v54 = vsel %vm855_vm13, 1.0, %v1446_v22 }
 0x17f   :  { %v865_v55 = vpack.c.bf16 %v1214_v54, %v1214_v54 }
 0x181   :  { %1235 = vmatprep.mubr.msk.bf16.mxu1 %vm973_vm6, %v865_v55 }
 0x184   :  { %1237 = vmatmul.mubr.msk.bf16.gmra.mrb[12].mxu1 %vm1236_vm15, %v1447_v36 }
 0x243   :  { %v1021_v57 = vpop.f32.mrb[4].mxu1 }
 0x244   :  { %v1022_v58 = vadd.f32 %v1215_v56, %v1021_v57  ;;  %v1023_v59 = vpop.f32.mrb[5].mxu1 }
 0x245   :  { %v1024_v60 = vpop.f32.mrb[6].mxu1 }
 0x246   :  { %vm1044_vm0 = vcmp.gt.f32.partialorder %v1022_v58, 1.0  ;;  %1049 = vst [vmem:[#allocation2 + $0x28] sm:$0xff] %v1022_v58  ;;  %v1025_v61 = vadd.f32 %v1215_v56, %v1024_v60  ;;  %v1050_v62 = vmul.f32 0.95, %v1022_v58  ;;  %v1026_v63 = vpop.f32.mrb[7].mxu1 }
 0x247   :  { %v1238_v0 = vsel %vm1044_vm0, 1.0, %v1446_v22 }
 0x248   :  { %1047 = vst [vmem:[#allocation2] sm:$0xff] %v1238_v0  ;;  %v1051_v1 = vadd.f32 %v1050_v62, %v1025_v61 }
 0x24a   :  { %v1052_v2 = vsub.f32 %v1051_v1, %v1238_v0 }
 0x24c   :  { %1059 = vst [vmem:[#allocation2 + $0x30] sm:$0xff] %v1052_v2  ;;  %vm1053_vm1 = vcmp.gt.f32.partialorder %v1052_v2, 1.0  ;;  %v1060_v6 = vmul.f32 0.95, %v1052_v2 }
 0x24d   :  { %v1239_v3 = vsel %vm1053_vm1, 1.0, %v1446_v22 }
 0x24e   :  { %1057 = vst [vmem:[#allocation2 + $0x8] sm:$0xff] %v1239_v3 }
 0x24f   :  { %v1029_v4 = vpop.f32.mrb[8].mxu1 }
 0x250   :  { %v1030_v5 = vadd.f32 %v1215_v56, %v1029_v4  ;;  %v1031_v7 = vpop.f32.mrb[9].mxu1 }
 0x251   :  { %v1032_v8 = vpop.f32.mrb[10].mxu1 }
 0x252   :  { %v1061_v9 = vadd.f32 %v1060_v6, %v1030_v5  ;;  %v1034_v10 = vpop.f32.mrb[11].mxu1  ;;  %v1033_v12 = vadd.f32 %v1215_v56, %v1032_v8 }
 0x254   :  { %v1062_v11 = vsub.f32 %v1061_v9, %v1239_v3 }
 0x256   :  { %1069 = vst [vmem:[#allocation2 + $0x38] sm:$0xff] %v1062_v11  ;;  %vm1063_vm2 = vcmp.gt.f32.partialorder %v1062_v11, 1.0  ;;  %v1070_v13 = vmul.f32 0.95, %v1062_v11 }
 0x257   :  { %v1240_v14 = vsel %vm1063_vm2, 1.0, %v1446_v22  ;;  %v1037_v15 = vpop.f32.mrb[12].mxu1 }
 0x258   :  { %1067 = vst [vmem:[#allocation2 + $0x10] sm:$0xff] %v1240_v14  ;;  %v1071_v16 = vadd.f32 %v1070_v13, %v1033_v12  ;;  %v1039_v17 = vpop.f32.mrb[13].mxu1  ;;  %v1038_v21 = vadd.f32 %v1215_v56, %v1037_v15 }
 0x259   :  { %v1040_v18 = vpop.f32.mrb[14].mxu1 }
 0x25a   :  { %v1072_v19 = vsub.f32 %v1071_v16, %v1240_v14  ;;  %v1041_v20 = vpop.f32.mrb[15].mxu1 }
 0x25c   :  { %1079 = vst [vmem:[#allocation2 + $0x40] sm:$0xff] %v1072_v19  ;;  %vm1073_vm3 = vcmp.gt.f32.partialorder %v1072_v19, 1.0  ;;  %v1080_v23 = vmul.f32 0.95, %v1072_v19 }
 0x25d   :  { %v1241_v24 = vsel %vm1073_vm3, 1.0, %v1446_v22 }
 0x25e   :  { %1077 = vst [vmem:[#allocation2 + $0x18] sm:$0xff] %v1241_v24  ;;  %v1081_v25 = vadd.f32 %v1080_v23, %v1038_v21 }
 0x260   :  { %v1082_v26 = vsub.f32 %v1081_v25, %v1241_v24 }
 0x262   :  { %vm1083_vm4 = vcmp.gt.f32.partialorder %v1082_v26, 1.0  ;;  %1089 = vst [vmem:[#allocation2 + $0x48] sm:$0xff] %v1082_v26 }
 0x263   :  { %v1242_v27 = vsel %vm1083_vm4, 1.0, %v1446_v22 }
 0x264   :  { %1087 = vst [vmem:[#allocation2 + $0x20] sm:$0xff] %v1242_v27 }
 0x265   :  { %1432 = shalt.err (!%p1429_p4)
}
 0x266   :  { %s1433_s8 = scalar_lea.hbm %s1893_s5, 1280 }
 0x267   :  { %p1434_p5 = scmp.ne.s32.totalorder %s1893_s5, %s1433_s8  ;;  %p1437_p6 = scmp.lt.u32.totalorder %s1433_s8, %s1893_s5 }
 0x269   :  { %p1439_p7 = pnand %p1437_p6, %p1434_p5 }
 0x26b   :  { %1442 = shalt.err (!%p1439_p7)
}
 0x26c   :  { %s1449_s13 = smov 128   ;;  %s1450_s14 = smov 8  }
 0x26d   :  { %1101 = dma.vmem_to_hbm [thread:$0]  %s1096_s29, 1280, %s1893_s5, [#allocation3], %s1449_s13, %s1449_s13, %s1450_s14  }
 0x26e   :  { %1443 = dma.done.wait [#allocation3], 1280  }
 0x26f   :  { %1444 = vsyncadd [#allocation3], 4294966016 }
 0x270   :  { %1105 = vsyncpa [#allocation3], 1 }

</bundles_post_ra>
